<compile_context>
chip_gen: v6e
topology: v6e:2x2x1
jax: 0.10.0
libtpu: 0.0.40
codegen_flags: <defaults>
</compile_context>

<pallas_src>
import jax
import jax.numpy as jnp
from jax import lax
from jax.experimental import pallas as pl
from jax.experimental.pallas import tpu as pltpu  # noqa: F401  (TPU backend assumed)


def _emotion_kernel(x_ref, ctx_ref, len_ref,
                    wih_ref, whh_ref, b_ref,
                    wemb_h_ref, wemb_c_ref, bemb_ref,
                    out_ref):
    """Single-invocation kernel: LSTM over T steps + relu + concat-linear.

    x_ref      : (T*B, D)    time-major word embeddings, flattened so the hoisted
                             input projection is one MXU call and per-step slices
                             are static sublane-tile-aligned windows
    ctx_ref    : (B, D)      BERT pooler output (context, cls-concat)
    len_ref    : (B, 1) i32  valid sequence lengths (packed-sequence semantics)
    wih_ref    : (D, 4H)     LSTM input weights  (pytorch W_ih transposed), gate order i,f,g,o
    whh_ref    : (H, 4H)     LSTM hidden weights (pytorch W_hh transposed)
    b_ref      : (1, 4H)     b_ih + b_hh
    wemb_h_ref : (H, Ep)     emotion_embedding block acting on the LSTM feature (lane-padded)
    wemb_c_ref : (D, Ep)     emotion_embedding block acting on the context      (lane-padded)
    bemb_ref   : (1, Ep)     emotion_embedding bias                             (lane-padded)
    out_ref    : (B, Ep)
    """
    TB, D = x_ref.shape
    B = ctx_ref.shape[0]
    T = TB // B
    H = whh_ref.shape[0]

    whh = whh_ref[...]

    # ---- hoisted input projection: all T timesteps in a single MXU call ----
    gx = (jnp.dot(x_ref[...], wih_ref[...], preferred_element_type=jnp.float32)
          + b_ref[...])                                      # (T*B, 4H)

    # ---- packed-sequence freeze masks, precomputed once ----
    lengths = len_ref[...]                                   # (B, 1) int32
    masks = (lax.broadcasted_iota(jnp.int32, (T, B, H), 0)
             < lengths[None, :, :])                          # (T, B, H) bool

    h = jnp.zeros((B, H), jnp.float32)
    c = jnp.zeros((B, H), jnp.float32)

    # ---- fully unrolled recurrence (T is small and static) ----
    # Per step: one (B,H)@(H,4H) MXU call, two full-width EUP calls, VPU combine.
    for t in range(T):
        gates = (jnp.dot(h, whh, preferred_element_type=jnp.float32)
                 + gx[t * B:(t + 1) * B, :])                 # (B, 4H)
        sg = jax.nn.sigmoid(gates)                           # i, f, o in one EUP pass
        tg = jnp.tanh(gates)                                 # g in one EUP pass
        i_g = sg[:, 0:H]
        f_g = sg[:, H:2 * H]
        g_g = tg[:, 2 * H:3 * H]
        o_g = sg[:, 3 * H:4 * H]
        c_new = f_g * c + i_g * g_g
        h_new = o_g * jnp.tanh(c_new)
        m = masks[t]                                         # (B, H), static index
        h = jnp.where(m, h_new, h)                           # freeze past end-of-sequence
        c = jnp.where(m, c_new, c)

    feat = jnp.maximum(h, 0.0)        # relu; dropout is identity in eval mode

    # concat([feat, ctx]) @ W_emb^T + b  ==  feat @ Wemb_h + ctx @ Wemb_c + b
    out = (jnp.dot(feat, wemb_h_ref[...], preferred_element_type=jnp.float32)
           + jnp.dot(ctx_ref[...], wemb_c_ref[...], preferred_element_type=jnp.float32)
           + bemb_ref[...])
    out_ref[...] = out.astype(out_ref.dtype)


def emotion_with_context_embedding(x_seq, lengths, x_context, params):
    """x_seq: (B, T, D) batch-first (PyTorch convention), lengths: (B,), x_context: (B, D)."""
    B, T, D = x_seq.shape
    H = params["whh"].shape[0]
    E = params["bemb"].shape[-1]

    # Pad batch to the 8-sublane native tile and output features to 128 lanes
    # (lane-dense unmasked store); both are sliced off after the call.
    B_pad = max(8, ((B + 7) // 8) * 8)
    E_pad = max(128, ((E + 127) // 128) * 128)

    # Time-major, batch-padded, flattened to (T*B_pad, D): layout plumbing only.
    x_tm = jnp.transpose(x_seq, (1, 0, 2)).astype(jnp.float32)            # (T, B, D)
    x_tm = jnp.pad(x_tm, ((0, 0), (0, B_pad - B), (0, 0)))
    x_flat = x_tm.reshape(T * B_pad, D)

    ctx = jnp.pad(x_context.astype(jnp.float32), ((0, B_pad - B), (0, 0)))
    len2d = jnp.pad(lengths.astype(jnp.int32), (0, B_pad - B)).reshape(B_pad, 1)

    wemb_h = jnp.pad(params["wemb_h"].astype(jnp.float32), ((0, 0), (0, E_pad - E)))
    wemb_c = jnp.pad(params["wemb_c"].astype(jnp.float32), ((0, 0), (0, E_pad - E)))
    bemb = jnp.pad(params["bemb"].astype(jnp.float32), ((0, 0), (0, E_pad - E)))

    args = (
        x_flat,                              # (T*B_pad, D)
        ctx,                                 # (B_pad, D)
        len2d,                               # (B_pad, 1) int32
        params["wih"].astype(jnp.float32),   # (D, 4H)
        params["whh"].astype(jnp.float32),   # (H, 4H)
        params["b"].astype(jnp.float32),     # (1, 4H)
        wemb_h,                              # (H, E_pad)
        wemb_c,                              # (D, E_pad)
        bemb,                                # (1, E_pad)
    )

    in_specs = [pl.BlockSpec(a.shape, lambda *_, n=a.ndim: (0,) * n) for a in args]
    out_spec = pl.BlockSpec((B_pad, E_pad), lambda: (0, 0))

    out = pl.pallas_call(
        _emotion_kernel,
        out_shape=jax.ShapeDtypeStruct((B_pad, E_pad), jnp.float32),
        in_specs=in_specs,
        out_specs=out_spec,
        # TODO(synk): for real (large) batches, add a grid over batch tiles with
        # dimension_semantics=("parallel",) so v7x's two TensorCores split B and
        # launch overhead is amortized; at B=4 a single invocation is optimal.
    )(*args)
    return out[:B, :E]


def _reference(x_seq, lengths, x_context, params):
    """Pure-JAX reference mirroring the PyTorch forward (eval mode)."""
    B, T, D = x_seq.shape
    H = params["whh"].shape[0]
    h = jnp.zeros((B, H), jnp.float32)
    c = jnp.zeros((B, H), jnp.float32)
    for t in range(T):
        x_t = x_seq[:, t, :]
        gates = x_t @ params["wih"] + h @ params["whh"] + params["b"]
        i_g = jax.nn.sigmoid(gates[:, 0:H])
        f_g = jax.nn.sigmoid(gates[:, H:2 * H])
        g_g = jnp.tanh(gates[:, 2 * H:3 * H])
        o_g = jax.nn.sigmoid(gates[:, 3 * H:4 * H])
        c_new = f_g * c + i_g * g_g
        h_new = o_g * jnp.tanh(c_new)
        mask = (t < lengths)[:, None]
        h = jnp.where(mask, h_new, h)
        c = jnp.where(mask, c_new, c)
    feat = jnp.maximum(h, 0.0)
    cat = jnp.concatenate([feat, x_context], axis=-1)
    w_full = jnp.concatenate([params["wemb_h"], params["wemb_c"]], axis=0)
    return cat @ w_full + params["bemb"]


if __name__ == "__main__":
    B, T, D, H, E = 4, 8, 32, 32, 16

    key = jax.random.PRNGKey(0)
    keys = jax.random.split(key, 8)

    # Deterministic synthetic parameters (PyTorch-init-like scale).
    scale_lstm = 1.0 / jnp.sqrt(H)
    params = {
        "wih":    (jax.random.uniform(keys[0], (D, 4 * H), jnp.float32, -1.0, 1.0) * scale_lstm),
        "whh":    (jax.random.uniform(keys[1], (H, 4 * H), jnp.float32, -1.0, 1.0) * scale_lstm),
        "b":      (jax.random.uniform(keys[2], (1, 4 * H), jnp.float32, -1.0, 1.0) * scale_lstm),
        "wemb_h": (jax.random.uniform(keys[3], (H, E), jnp.float32, -1.0, 1.0) / jnp.sqrt(H + D)),
        "wemb_c": (jax.random.uniform(keys[4], (D, E), jnp.float32, -1.0, 1.0) / jnp.sqrt(H + D)),
        "bemb":   (jax.random.uniform(keys[5], (1, E), jnp.float32, -1.0, 1.0) / jnp.sqrt(H + D)),
    }

    # Synthetic "BERT outputs": token embeddings (last_hidden_state) + pooler output.
    x_seq = jax.random.normal(keys[6], (B, T, D), jnp.float32)
    x_context = jax.random.normal(keys[7], (B, D), jnp.float32)
    lengths = jnp.array([8, 5, 3, 7], dtype=jnp.int32)

    out = emotion_with_context_embedding(x_seq, lengths, x_context, params)
    out = jax.block_until_ready(out)

    ref = _reference(x_seq, lengths, x_context, params)
    assert out.shape == (B, E)
    assert jnp.allclose(out, ref, atol=1e-5, rtol=1e-5), "Pallas kernel mismatch vs reference"

    print("KERNEL_OK")
</pallas_src>

<mosaic_0001>
module attributes {stable_mosaic.version = 11 : i64} {
  func.func @_emotion_kernel(%arg0: memref<64x32xf32, #tpu.memory_space<vmem>>, %arg1: memref<8x32xf32, #tpu.memory_space<vmem>>, %arg2: memref<8x1xi32, #tpu.memory_space<vmem>>, %arg3: memref<32x128xf32, #tpu.memory_space<vmem>>, %arg4: memref<32x128xf32, #tpu.memory_space<vmem>>, %arg5: memref<1x128xf32, #tpu.memory_space<vmem>>, %arg6: memref<32x128xf32, #tpu.memory_space<vmem>>, %arg7: memref<32x128xf32, #tpu.memory_space<vmem>>, %arg8: memref<1x128xf32, #tpu.memory_space<vmem>>, %arg9: memref<8x128xf32, #tpu.memory_space<vmem>>) attributes {dimension_semantics = [], scalar_prefetch = 0 : i64, scratch_operands = 0 : i64, tpu.core_type = #tpu.core_type<tc>} {
    %c0 = arith.constant 0 : index
    %c0_0 = arith.constant 0 : index
    %0 = vector.load %arg4[%c0, %c0_0] : memref<32x128xf32, #tpu.memory_space<vmem>>, vector<32x128xf32>
    %c0_1 = arith.constant 0 : index
    %c0_2 = arith.constant 0 : index
    %1 = vector.load %arg0[%c0_1, %c0_2] : memref<64x32xf32, #tpu.memory_space<vmem>>, vector<64x32xf32>
    %c0_3 = arith.constant 0 : index
    %c0_4 = arith.constant 0 : index
    %2 = vector.load %arg3[%c0_3, %c0_4] : memref<32x128xf32, #tpu.memory_space<vmem>>, vector<32x128xf32>
    %cst = arith.constant dense<0.000000e+00> : vector<64x128xf32>
    %3 = tpu.matmul %1, %2, %cst {dimension_numbers = #tpu.dot_dimension_numbers<[1], [0], [0], [1], [0, 0, 1, 1], [], []>} : vector<64x32xf32>, vector<32x128xf32>, vector<64x128xf32> -> vector<64x128xf32>
    %c0_5 = arith.constant 0 : index
    %c0_6 = arith.constant 0 : index
    %4 = vector.load %arg5[%c0_5, %c0_6] : memref<1x128xf32, #tpu.memory_space<vmem>>, vector<1x128xf32>
    %5 = vector.broadcast %4 : vector<1x128xf32> to vector<64x128xf32>
    %6 = arith.addf %3, %5 : vector<64x128xf32>
    %c0_7 = arith.constant 0 : index
    %c0_8 = arith.constant 0 : index
    %7 = vector.load %arg2[%c0_7, %c0_8] : memref<8x1xi32, #tpu.memory_space<vmem>>, vector<8x1xi32>
    %8 = tpu.iota {dimensions = array<i32: 0>} : vector<8x8x32xi32>
    %9 = vector.shape_cast %7 : vector<8x1xi32> to vector<1x8x1xi32>
    %10 = vector.broadcast %9 : vector<1x8x1xi32> to vector<8x8x32xi32>
    %11 = arith.cmpi slt, %8, %10 : vector<8x8x32xi32>
    %cst_9 = arith.constant 0.000000e+00 : f32
    %12 = vector.broadcast %cst_9 : f32 to vector<8x32xf32>
    %cst_10 = arith.constant 0.000000e+00 : f32
    %13 = vector.broadcast %cst_10 : f32 to vector<8x32xf32>
    %cst_11 = arith.constant dense<0.000000e+00> : vector<8x128xf32>
    %14 = tpu.matmul %12, %0, %cst_11 {dimension_numbers = #tpu.dot_dimension_numbers<[1], [0], [0], [1], [0, 0, 1, 1], [], []>} : vector<8x32xf32>, vector<32x128xf32>, vector<8x128xf32> -> vector<8x128xf32>
    %15 = vector.extract_strided_slice %6 {offsets = [0, 0], sizes = [8, 128], strides = [1, 1]} : vector<64x128xf32> to vector<8x128xf32>
    %16 = arith.addf %14, %15 : vector<8x128xf32>
    %17 = arith.negf %16 : vector<8x128xf32>
    %18 = math.exp %17 : vector<8x128xf32>
    %cst_12 = arith.constant 1.000000e+00 : f32
    %19 = vector.broadcast %cst_12 : f32 to vector<8x128xf32>
    %20 = arith.addf %19, %18 : vector<8x128xf32>
    %21 = arith.divf %19, %20 : vector<8x128xf32>
    %22 = math.tanh %16 : vector<8x128xf32>
    %23 = vector.extract_strided_slice %21 {offsets = [0, 0], sizes = [8, 32], strides = [1, 1]} : vector<8x128xf32> to vector<8x32xf32>
    %24 = vector.extract_strided_slice %21 {offsets = [0, 32], sizes = [8, 32], strides = [1, 1]} : vector<8x128xf32> to vector<8x32xf32>
    %25 = vector.extract_strided_slice %22 {offsets = [0, 64], sizes = [8, 32], strides = [1, 1]} : vector<8x128xf32> to vector<8x32xf32>
    %26 = vector.extract_strided_slice %21 {offsets = [0, 96], sizes = [8, 32], strides = [1, 1]} : vector<8x128xf32> to vector<8x32xf32>
    %27 = arith.mulf %24, %13 : vector<8x32xf32>
    %28 = arith.mulf %23, %25 : vector<8x32xf32>
    %29 = arith.addf %27, %28 : vector<8x32xf32>
    %30 = math.tanh %29 : vector<8x32xf32>
    %31 = arith.mulf %26, %30 : vector<8x32xf32>
    %32 = vector.extract_strided_slice %11 {offsets = [0, 0, 0], sizes = [1, 8, 32], strides = [1, 1, 1]} : vector<8x8x32xi1> to vector<1x8x32xi1>
    %33 = vector.shape_cast %32 : vector<1x8x32xi1> to vector<8x32xi1>
    %34 = arith.select %33, %31, %12 : vector<8x32xi1>, vector<8x32xf32>
    %35 = arith.select %33, %29, %13 : vector<8x32xi1>, vector<8x32xf32>
    %cst_13 = arith.constant dense<0.000000e+00> : vector<8x128xf32>
    %36 = tpu.matmul %34, %0, %cst_13 {dimension_numbers = #tpu.dot_dimension_numbers<[1], [0], [0], [1], [0, 0, 1, 1], [], []>} : vector<8x32xf32>, vector<32x128xf32>, vector<8x128xf32> -> vector<8x128xf32>
    %37 = vector.extract_strided_slice %6 {offsets = [8, 0], sizes = [8, 128], strides = [1, 1]} : vector<64x128xf32> to vector<8x128xf32>
    %38 = arith.addf %36, %37 : vector<8x128xf32>
    %39 = arith.negf %38 : vector<8x128xf32>
    %40 = math.exp %39 : vector<8x128xf32>
    %cst_14 = arith.constant 1.000000e+00 : f32
    %41 = vector.broadcast %cst_14 : f32 to vector<8x128xf32>
    %42 = arith.addf %41, %40 : vector<8x128xf32>
    %43 = arith.divf %41, %42 : vector<8x128xf32>
    %44 = math.tanh %38 : vector<8x128xf32>
    %45 = vector.extract_strided_slice %43 {offsets = [0, 0], sizes = [8, 32], strides = [1, 1]} : vector<8x128xf32> to vector<8x32xf32>
    %46 = vector.extract_strided_slice %43 {offsets = [0, 32], sizes = [8, 32], strides = [1, 1]} : vector<8x128xf32> to vector<8x32xf32>
    %47 = vector.extract_strided_slice %44 {offsets = [0, 64], sizes = [8, 32], strides = [1, 1]} : vector<8x128xf32> to vector<8x32xf32>
    %48 = vector.extract_strided_slice %43 {offsets = [0, 96], sizes = [8, 32], strides = [1, 1]} : vector<8x128xf32> to vector<8x32xf32>
    %49 = arith.mulf %46, %35 : vector<8x32xf32>
    %50 = arith.mulf %45, %47 : vector<8x32xf32>
    %51 = arith.addf %49, %50 : vector<8x32xf32>
    %52 = math.tanh %51 : vector<8x32xf32>
    %53 = arith.mulf %48, %52 : vector<8x32xf32>
    %54 = vector.extract_strided_slice %11 {offsets = [1, 0, 0], sizes = [1, 8, 32], strides = [1, 1, 1]} : vector<8x8x32xi1> to vector<1x8x32xi1>
    %55 = vector.shape_cast %54 : vector<1x8x32xi1> to vector<8x32xi1>
    %56 = arith.select %55, %53, %34 : vector<8x32xi1>, vector<8x32xf32>
    %57 = arith.select %55, %51, %35 : vector<8x32xi1>, vector<8x32xf32>
    %cst_15 = arith.constant dense<0.000000e+00> : vector<8x128xf32>
    %58 = tpu.matmul %56, %0, %cst_15 {dimension_numbers = #tpu.dot_dimension_numbers<[1], [0], [0], [1], [0, 0, 1, 1], [], []>} : vector<8x32xf32>, vector<32x128xf32>, vector<8x128xf32> -> vector<8x128xf32>
    %59 = vector.extract_strided_slice %6 {offsets = [16, 0], sizes = [8, 128], strides = [1, 1]} : vector<64x128xf32> to vector<8x128xf32>
    %60 = arith.addf %58, %59 : vector<8x128xf32>
    %61 = arith.negf %60 : vector<8x128xf32>
    %62 = math.exp %61 : vector<8x128xf32>
    %cst_16 = arith.constant 1.000000e+00 : f32
    %63 = vector.broadcast %cst_16 : f32 to vector<8x128xf32>
    %64 = arith.addf %63, %62 : vector<8x128xf32>
    %65 = arith.divf %63, %64 : vector<8x128xf32>
    %66 = math.tanh %60 : vector<8x128xf32>
    %67 = vector.extract_strided_slice %65 {offsets = [0, 0], sizes = [8, 32], strides = [1, 1]} : vector<8x128xf32> to vector<8x32xf32>
    %68 = vector.extract_strided_slice %65 {offsets = [0, 32], sizes = [8, 32], strides = [1, 1]} : vector<8x128xf32> to vector<8x32xf32>
    %69 = vector.extract_strided_slice %66 {offsets = [0, 64], sizes = [8, 32], strides = [1, 1]} : vector<8x128xf32> to vector<8x32xf32>
    %70 = vector.extract_strided_slice %65 {offsets = [0, 96], sizes = [8, 32], strides = [1, 1]} : vector<8x128xf32> to vector<8x32xf32>
    %71 = arith.mulf %68, %57 : vector<8x32xf32>
    %72 = arith.mulf %67, %69 : vector<8x32xf32>
    %73 = arith.addf %71, %72 : vector<8x32xf32>
    %74 = math.tanh %73 : vector<8x32xf32>
    %75 = arith.mulf %70, %74 : vector<8x32xf32>
    %76 = vector.extract_strided_slice %11 {offsets = [2, 0, 0], sizes = [1, 8, 32], strides = [1, 1, 1]} : vector<8x8x32xi1> to vector<1x8x32xi1>
    %77 = vector.shape_cast %76 : vector<1x8x32xi1> to vector<8x32xi1>
    %78 = arith.select %77, %75, %56 : vector<8x32xi1>, vector<8x32xf32>
    %79 = arith.select %77, %73, %57 : vector<8x32xi1>, vector<8x32xf32>
    %cst_17 = arith.constant dense<0.000000e+00> : vector<8x128xf32>
    %80 = tpu.matmul %78, %0, %cst_17 {dimension_numbers = #tpu.dot_dimension_numbers<[1], [0], [0], [1], [0, 0, 1, 1], [], []>} : vector<8x32xf32>, vector<32x128xf32>, vector<8x128xf32> -> vector<8x128xf32>
    %81 = vector.extract_strided_slice %6 {offsets = [24, 0], sizes = [8, 128], strides = [1, 1]} : vector<64x128xf32> to vector<8x128xf32>
    %82 = arith.addf %80, %81 : vector<8x128xf32>
    %83 = arith.negf %82 : vector<8x128xf32>
    %84 = math.exp %83 : vector<8x128xf32>
    %cst_18 = arith.constant 1.000000e+00 : f32
    %85 = vector.broadcast %cst_18 : f32 to vector<8x128xf32>
    %86 = arith.addf %85, %84 : vector<8x128xf32>
    %87 = arith.divf %85, %86 : vector<8x128xf32>
    %88 = math.tanh %82 : vector<8x128xf32>
    %89 = vector.extract_strided_slice %87 {offsets = [0, 0], sizes = [8, 32], strides = [1, 1]} : vector<8x128xf32> to vector<8x32xf32>
    %90 = vector.extract_strided_slice %87 {offsets = [0, 32], sizes = [8, 32], strides = [1, 1]} : vector<8x128xf32> to vector<8x32xf32>
    %91 = vector.extract_strided_slice %88 {offsets = [0, 64], sizes = [8, 32], strides = [1, 1]} : vector<8x128xf32> to vector<8x32xf32>
    %92 = vector.extract_strided_slice %87 {offsets = [0, 96], sizes = [8, 32], strides = [1, 1]} : vector<8x128xf32> to vector<8x32xf32>
    %93 = arith.mulf %90, %79 : vector<8x32xf32>
    %94 = arith.mulf %89, %91 : vector<8x32xf32>
    %95 = arith.addf %93, %94 : vector<8x32xf32>
    %96 = math.tanh %95 : vector<8x32xf32>
    %97 = arith.mulf %92, %96 : vector<8x32xf32>
    %98 = vector.extract_strided_slice %11 {offsets = [3, 0, 0], sizes = [1, 8, 32], strides = [1, 1, 1]} : vector<8x8x32xi1> to vector<1x8x32xi1>
    %99 = vector.shape_cast %98 : vector<1x8x32xi1> to vector<8x32xi1>
    %100 = arith.select %99, %97, %78 : vector<8x32xi1>, vector<8x32xf32>
    %101 = arith.select %99, %95, %79 : vector<8x32xi1>, vector<8x32xf32>
    %cst_19 = arith.constant dense<0.000000e+00> : vector<8x128xf32>
    %102 = tpu.matmul %100, %0, %cst_19 {dimension_numbers = #tpu.dot_dimension_numbers<[1], [0], [0], [1], [0, 0, 1, 1], [], []>} : vector<8x32xf32>, vector<32x128xf32>, vector<8x128xf32> -> vector<8x128xf32>
    %103 = vector.extract_strided_slice %6 {offsets = [32, 0], sizes = [8, 128], strides = [1, 1]} : vector<64x128xf32> to vector<8x128xf32>
    %104 = arith.addf %102, %103 : vector<8x128xf32>
    %105 = arith.negf %104 : vector<8x128xf32>
    %106 = math.exp %105 : vector<8x128xf32>
    %cst_20 = arith.constant 1.000000e+00 : f32
    %107 = vector.broadcast %cst_20 : f32 to vector<8x128xf32>
    %108 = arith.addf %107, %106 : vector<8x128xf32>
    %109 = arith.divf %107, %108 : vector<8x128xf32>
    %110 = math.tanh %104 : vector<8x128xf32>
    %111 = vector.extract_strided_slice %109 {offsets = [0, 0], sizes = [8, 32], strides = [1, 1]} : vector<8x128xf32> to vector<8x32xf32>
    %112 = vector.extract_strided_slice %109 {offsets = [0, 32], sizes = [8, 32], strides = [1, 1]} : vector<8x128xf32> to vector<8x32xf32>
    %113 = vector.extract_strided_slice %110 {offsets = [0, 64], sizes = [8, 32], strides = [1, 1]} : vector<8x128xf32> to vector<8x32xf32>
    %114 = vector.extract_strided_slice %109 {offsets = [0, 96], sizes = [8, 32], strides = [1, 1]} : vector<8x128xf32> to vector<8x32xf32>
    %115 = arith.mulf %112, %101 : vector<8x32xf32>
    %116 = arith.mulf %111, %113 : vector<8x32xf32>
    %117 = arith.addf %115, %116 : vector<8x32xf32>
    %118 = math.tanh %117 : vector<8x32xf32>
    %119 = arith.mulf %114, %118 : vector<8x32xf32>
    %120 = vector.extract_strided_slice %11 {offsets = [4, 0, 0], sizes = [1, 8, 32], strides = [1, 1, 1]} : vector<8x8x32xi1> to vector<1x8x32xi1>
    %121 = vector.shape_cast %120 : vector<1x8x32xi1> to vector<8x32xi1>
    %122 = arith.select %121, %119, %100 : vector<8x32xi1>, vector<8x32xf32>
    %123 = arith.select %121, %117, %101 : vector<8x32xi1>, vector<8x32xf32>
    %cst_21 = arith.constant dense<0.000000e+00> : vector<8x128xf32>
    %124 = tpu.matmul %122, %0, %cst_21 {dimension_numbers = #tpu.dot_dimension_numbers<[1], [0], [0], [1], [0, 0, 1, 1], [], []>} : vector<8x32xf32>, vector<32x128xf32>, vector<8x128xf32> -> vector<8x128xf32>
    %125 = vector.extract_strided_slice %6 {offsets = [40, 0], sizes = [8, 128], strides = [1, 1]} : vector<64x128xf32> to vector<8x128xf32>
    %126 = arith.addf %124, %125 : vector<8x128xf32>
    %127 = arith.negf %126 : vector<8x128xf32>
    %128 = math.exp %127 : vector<8x128xf32>
    %cst_22 = arith.constant 1.000000e+00 : f32
    %129 = vector.broadcast %cst_22 : f32 to vector<8x128xf32>
    %130 = arith.addf %129, %128 : vector<8x128xf32>
    %131 = arith.divf %129, %130 : vector<8x128xf32>
    %132 = math.tanh %126 : vector<8x128xf32>
    %133 = vector.extract_strided_slice %131 {offsets = [0, 0], sizes = [8, 32], strides = [1, 1]} : vector<8x128xf32> to vector<8x32xf32>
    %134 = vector.extract_strided_slice %131 {offsets = [0, 32], sizes = [8, 32], strides = [1, 1]} : vector<8x128xf32> to vector<8x32xf32>
    %135 = vector.extract_strided_slice %132 {offsets = [0, 64], sizes = [8, 32], strides = [1, 1]} : vector<8x128xf32> to vector<8x32xf32>
    %136 = vector.extract_strided_slice %131 {offsets = [0, 96], sizes = [8, 32], strides = [1, 1]} : vector<8x128xf32> to vector<8x32xf32>
    %137 = arith.mulf %134, %123 : vector<8x32xf32>
    %138 = arith.mulf %133, %135 : vector<8x32xf32>
    %139 = arith.addf %137, %138 : vector<8x32xf32>
    %140 = math.tanh %139 : vector<8x32xf32>
    %141 = arith.mulf %136, %140 : vector<8x32xf32>
    %142 = vector.extract_strided_slice %11 {offsets = [5, 0, 0], sizes = [1, 8, 32], strides = [1, 1, 1]} : vector<8x8x32xi1> to vector<1x8x32xi1>
    %143 = vector.shape_cast %142 : vector<1x8x32xi1> to vector<8x32xi1>
    %144 = arith.select %143, %141, %122 : vector<8x32xi1>, vector<8x32xf32>
    %145 = arith.select %143, %139, %123 : vector<8x32xi1>, vector<8x32xf32>
    %cst_23 = arith.constant dense<0.000000e+00> : vector<8x128xf32>
    %146 = tpu.matmul %144, %0, %cst_23 {dimension_numbers = #tpu.dot_dimension_numbers<[1], [0], [0], [1], [0, 0, 1, 1], [], []>} : vector<8x32xf32>, vector<32x128xf32>, vector<8x128xf32> -> vector<8x128xf32>
    %147 = vector.extract_strided_slice %6 {offsets = [48, 0], sizes = [8, 128], strides = [1, 1]} : vector<64x128xf32> to vector<8x128xf32>
    %148 = arith.addf %146, %147 : vector<8x128xf32>
    %149 = arith.negf %148 : vector<8x128xf32>
    %150 = math.exp %149 : vector<8x128xf32>
    %cst_24 = arith.constant 1.000000e+00 : f32
    %151 = vector.broadcast %cst_24 : f32 to vector<8x128xf32>
    %152 = arith.addf %151, %150 : vector<8x128xf32>
    %153 = arith.divf %151, %152 : vector<8x128xf32>
    %154 = math.tanh %148 : vector<8x128xf32>
    %155 = vector.extract_strided_slice %153 {offsets = [0, 0], sizes = [8, 32], strides = [1, 1]} : vector<8x128xf32> to vector<8x32xf32>
    %156 = vector.extract_strided_slice %153 {offsets = [0, 32], sizes = [8, 32], strides = [1, 1]} : vector<8x128xf32> to vector<8x32xf32>
    %157 = vector.extract_strided_slice %154 {offsets = [0, 64], sizes = [8, 32], strides = [1, 1]} : vector<8x128xf32> to vector<8x32xf32>
    %158 = vector.extract_strided_slice %153 {offsets = [0, 96], sizes = [8, 32], strides = [1, 1]} : vector<8x128xf32> to vector<8x32xf32>
    %159 = arith.mulf %156, %145 : vector<8x32xf32>
    %160 = arith.mulf %155, %157 : vector<8x32xf32>
    %161 = arith.addf %159, %160 : vector<8x32xf32>
    %162 = math.tanh %161 : vector<8x32xf32>
    %163 = arith.mulf %158, %162 : vector<8x32xf32>
    %164 = vector.extract_strided_slice %11 {offsets = [6, 0, 0], sizes = [1, 8, 32], strides = [1, 1, 1]} : vector<8x8x32xi1> to vector<1x8x32xi1>
    %165 = vector.shape_cast %164 : vector<1x8x32xi1> to vector<8x32xi1>
    %166 = arith.select %165, %163, %144 : vector<8x32xi1>, vector<8x32xf32>
    %167 = arith.select %165, %161, %145 : vector<8x32xi1>, vector<8x32xf32>
    %cst_25 = arith.constant dense<0.000000e+00> : vector<8x128xf32>
    %168 = tpu.matmul %166, %0, %cst_25 {dimension_numbers = #tpu.dot_dimension_numbers<[1], [0], [0], [1], [0, 0, 1, 1], [], []>} : vector<8x32xf32>, vector<32x128xf32>, vector<8x128xf32> -> vector<8x128xf32>
    %169 = vector.extract_strided_slice %6 {offsets = [56, 0], sizes = [8, 128], strides = [1, 1]} : vector<64x128xf32> to vector<8x128xf32>
    %170 = arith.addf %168, %169 : vector<8x128xf32>
    %171 = arith.negf %170 : vector<8x128xf32>
    %172 = math.exp %171 : vector<8x128xf32>
    %cst_26 = arith.constant 1.000000e+00 : f32
    %173 = vector.broadcast %cst_26 : f32 to vector<8x128xf32>
    %174 = arith.addf %173, %172 : vector<8x128xf32>
    %175 = arith.divf %173, %174 : vector<8x128xf32>
    %176 = math.tanh %170 : vector<8x128xf32>
    %177 = vector.extract_strided_slice %175 {offsets = [0, 0], sizes = [8, 32], strides = [1, 1]} : vector<8x128xf32> to vector<8x32xf32>
    %178 = vector.extract_strided_slice %175 {offsets = [0, 32], sizes = [8, 32], strides = [1, 1]} : vector<8x128xf32> to vector<8x32xf32>
    %179 = vector.extract_strided_slice %176 {offsets = [0, 64], sizes = [8, 32], strides = [1, 1]} : vector<8x128xf32> to vector<8x32xf32>
    %180 = vector.extract_strided_slice %175 {offsets = [0, 96], sizes = [8, 32], strides = [1, 1]} : vector<8x128xf32> to vector<8x32xf32>
    %181 = arith.mulf %178, %167 : vector<8x32xf32>
    %182 = arith.mulf %177, %179 : vector<8x32xf32>
    %183 = arith.addf %181, %182 : vector<8x32xf32>
    %184 = math.tanh %183 : vector<8x32xf32>
    %185 = arith.mulf %180, %184 : vector<8x32xf32>
    %186 = vector.extract_strided_slice %11 {offsets = [7, 0, 0], sizes = [1, 8, 32], strides = [1, 1, 1]} : vector<8x8x32xi1> to vector<1x8x32xi1>
    %187 = vector.shape_cast %186 : vector<1x8x32xi1> to vector<8x32xi1>
    %188 = arith.select %187, %185, %166 : vector<8x32xi1>, vector<8x32xf32>
    %cst_27 = arith.constant 0.000000e+00 : f32
    %189 = vector.broadcast %cst_27 : f32 to vector<8x32xf32>
    %190 = arith.maximumf %188, %189 : vector<8x32xf32>
    %c0_28 = arith.constant 0 : index
    %c0_29 = arith.constant 0 : index
    %191 = vector.load %arg6[%c0_28, %c0_29] : memref<32x128xf32, #tpu.memory_space<vmem>>, vector<32x128xf32>
    %cst_30 = arith.constant dense<0.000000e+00> : vector<8x128xf32>
    %192 = tpu.matmul %190, %191, %cst_30 {dimension_numbers = #tpu.dot_dimension_numbers<[1], [0], [0], [1], [0, 0, 1, 1], [], []>} : vector<8x32xf32>, vector<32x128xf32>, vector<8x128xf32> -> vector<8x128xf32>
    %c0_31 = arith.constant 0 : index
    %c0_32 = arith.constant 0 : index
    %193 = vector.load %arg1[%c0_31, %c0_32] : memref<8x32xf32, #tpu.memory_space<vmem>>, vector<8x32xf32>
    %c0_33 = arith.constant 0 : index
    %c0_34 = arith.constant 0 : index
    %194 = vector.load %arg7[%c0_33, %c0_34] : memref<32x128xf32, #tpu.memory_space<vmem>>, vector<32x128xf32>
    %cst_35 = arith.constant dense<0.000000e+00> : vector<8x128xf32>
    %195 = tpu.matmul %193, %194, %cst_35 {dimension_numbers = #tpu.dot_dimension_numbers<[1], [0], [0], [1], [0, 0, 1, 1], [], []>} : vector<8x32xf32>, vector<32x128xf32>, vector<8x128xf32> -> vector<8x128xf32>
    %196 = arith.addf %192, %195 : vector<8x128xf32>
    %c0_36 = arith.constant 0 : index
    %c0_37 = arith.constant 0 : index
    %197 = vector.load %arg8[%c0_36, %c0_37] : memref<1x128xf32, #tpu.memory_space<vmem>>, vector<1x128xf32>
    %198 = vector.broadcast %197 : vector<1x128xf32> to vector<8x128xf32>
    %199 = arith.addf %196, %198 : vector<8x128xf32>
    %c0_38 = arith.constant 0 : index
    %c0_39 = arith.constant 0 : index
    %200 = vector.load %arg9[%c0_38, %c0_39] : memref<8x128xf32, #tpu.memory_space<vmem>>, vector<8x128xf32>
    tpu.vector_store %arg9[%c0_38, %c0_39], %199 {strides = array<i32>} : memref<8x128xf32, #tpu.memory_space<vmem>>, vector<8x128xf32>,
    return
  }
}

</mosaic_0001>

<bundles_post_ra>
// kernel: tpu_custom_call.1
= control target key start
LH: loop header
LB: loop body
LE: loop exit
PB: predicated region body
PF: predicated region fallthrough
CT: control target
= control target key end

     0   :  { %14 = vsyncpa [#allocation3], 0  ;;  %s1884_s0 = inlined_call_operand.vmem [shape: f32[64,32], index: 0, kind: input, shape index: {}]   ;;  %s1885_s1 = inlined_call_operand.vmem [shape: f32[8,32], index: 1, kind: input, shape index: {}]   ;;  %s1886_s2 = inlined_call_operand.vmem [shape: s32[8,1], index: 2, kind: input, shape index: {}]   ;;  %s1887_s3 = inlined_call_operand.vmem [shape: f32[32,128], index: 3, kind: input, shape index: {}]   ;;  %s1888_s4 = inlined_call_operand.vmem [shape: f32[32,128], index: 4, kind: input, shape index: {}]   ;;  %s1889_s5 = inlined_call_operand.vmem [shape: f32[1,128], index: 5, kind: input, shape index: {}]   ;;  %s1890_s6 = inlined_call_operand.vmem [shape: f32[32,128], index: 6, kind: input, shape index: {}]   ;;  %s1891_s7 = inlined_call_operand.hbm [shape: f32[32,128], index: 7, kind: input, shape index: {}]   ;;  %s1892_s8 = inlined_call_operand.vmem [shape: f32[1,128], index: 8, kind: input, shape index: {}]   ;;  %s1893_s9 = inlined_call_operand.hbm [shape: f32[8,128], index: 9, kind: output, shape index: {}]  }
   0x1   :  { %15 = vsyncpa [#allocation4], 0  ;;  %s1537_s30 = smov [#allocation2]  }
   0x2   :  { %s35_s10 = sshll.u32 %s1537_s30, 4  ;;  %s36_s10 = int_to_ptr.vmem [resolvable:$true] %s35_s10 }
   0x3   :  { %s1501_s11 = scalar_lea.vmem %s36_s10, 512  ;;  %p1506_p1 = scmp.lt.s32.totalorder %s36_s10, %s36_s10 }
   0x4   :  { %p1502_p0 = scmp.ne.s32.totalorder %s36_s10, %s1501_s11  ;;  %p1507_p2 = scmp.lt.s32.totalorder %s1501_s11, %s1501_s11 }
   0x6   :  { %p1508_p3 = por %p1507_p2, %p1506_p1 }
   0x8   :  { %p1509_p4 = pnand %p1508_p3, %p1502_p0 }
   0xa   :  { %1512 = shalt.err (!%p1509_p4)
}
   0xb   :  { %s1538_s12 = smov 128   ;;  %s1539_s13 = smov 8  }
   0xc   :  { %41 = dma.hbm_to_vmem [thread:$0]  %s1891_s7, 512, %s36_s10, [#allocation3], %s1538_s12, %s1538_s12, %s1539_s13  }
   0xd   :  { %1533 = dma.done.wait [#allocation3], 512  }
   0xe   :  { %1534 = vsyncadd [#allocation3], 4294966784  ;;  %v1540_v0 = vmov 0.0   ;;  %vm1541_vm0 = vmmov 0   ;;  %v62_v1 = vld [vmem:[%s1887_s3 + $0x18] sm:$0xff]  ;;  %v61_v2 = vld [vmem:[%s1887_s3 + $0x10] sm:$0xff] }
   0xf   :  { %1308 = vmatprep.subr.mxu1 %v1540_v0  ;;  %1316 = vmatprep.mubr.msk.f32.mxu1 %vm1541_vm0, %v1540_v0  ;;  %v1611_v3 = vld [vmem:[%s1888_s4 + $0x18] sm:$0xff]  ;;  %v1617_v4 = vld [vmem:[%s1888_s4 + $0x10] sm:$0xff]  ;;  %v60_v5 = vld [vmem:[%s1887_s3 + $0x8] sm:$0xff]  ;;  %vm70_vm1 = vcmask 261120   ;;  %v1542_v12 = vmov 0   ;;  %s1543_s16 = smov 64  }
  0x10   :  { %1288 = vmatprep.subr.mxu0 %v62_v1  ;;  %1309 = vmatpush3.msra.mxu1 %v1611_v3  ;;  %v51_v6 = vld [vmem:[%s1884_s0] sm:$0xff]  ;;  %v1630_v7 = vld [vmem:[%s1888_s4 + $0x8] sm:$0xff]  ;;  %v53_v51 = vld [vmem:[%s1884_s0 + $0x10] sm:$0xff] }
  0x11   :  { %1289 = vmatpush3.msra.mxu0 %v62_v1  ;;  %1310 = vmatprep.subr.mxu1 %v1540_v0  ;;  %v59_v8 = vld [vmem:[%s1887_s3] sm:$0xff]  ;;  %v52_v10 = vld [vmem:[%s1884_s0 + $0x8] sm:$0xff]  ;;  %v54_v52 = vld [vmem:[%s1884_s0 + $0x18] sm:$0xff] }
  0x12   :  { %1290 = vmatprep.subr.mxu0 %v61_v2  ;;  %1311 = vmatpush3.msra.mxu1 %v1617_v4  ;;  %v1640_v9 = vld [vmem:[%s1888_s4] sm:$0xff]  ;;  %v56_v54 = vld [vmem:[%s1884_s0 + $0x28] sm:$0xff]  ;;  %v57_v55 = vld [vmem:[%s1884_s0 + $0x30] sm:$0xff]  ;;  %s1545_s4 = smov [#allocation5]  }
  0x13   :  { %1291 = vmatpush3.msra.mxu0 %v61_v2  ;;  %1312 = vmatprep.subr.mxu1 %v1540_v0  ;;  %v200_v11 = vld [vmem:[%s1886_s2] sm:$0xff]  ;;  %s1544_s2 = smov 32   ;;  %v58_v56 = vld [vmem:[%s1884_s0 + $0x38] sm:$0xff]  ;;  %s1190_s14 = sshll.u32 %s1545_s4, 4  ;;  %s1191_s14 = int_to_ptr.vmem [resolvable:$true] %s1190_s14 }
  0x14   :  { %1292 = vmatprep.subr.mxu0 %v60_v5  ;;  %1296 = vmatprep.mubr.msk.f32.mxu0 %vm70_vm1, %v51_v6  ;;  %v1676_v15 = vld [vmem:[%s1889_s5] ss:$0 sm:$0xff]  ;;  %s1513_s15 = scalar_lea.vmem %s1191_s14, 128  ;;  %p1518_p6 = scmp.lt.s32.totalorder %s1191_s14, %s1191_s14 }
  0x15   :  { %1293 = vmatpush3.msra.mxu0 %v60_v5  ;;  %1313 = vmatpush3.msra.mxu1 %v1630_v7  ;;  %v55_v53 = vld [vmem:[%s1884_s0 + $0x20] sm:$0xff]  ;;  %p1514_p5 = scmp.ne.s32.totalorder %s1191_s14, %s1513_s15  ;;  %p1519_p7 = scmp.lt.s32.totalorder %s1513_s15, %s1513_s15 }
  0x16   :  { %1294 = vmatprep.subr.mxu0 %v59_v8  ;;  %1314 = vmatprep.subr.mxu1 %v1540_v0 }
  0x17   :  { %1295 = vmatpush3.msra.mxu0 %v59_v8  ;;  %1315 = vmatpush3.msra.mxu1 %v1640_v9  ;;  %p1520_p8 = por %p1519_p7, %p1518_p6 }
  0x18   :  { %1297 = vmatmul.mubr.msk.f32.vlgmr.msra.gmra.mxu0 %vm70_vm1, %v52_v10  ;;  %1317 = vmatmul.mubr.f32.vlgmr.msra.gmra.mxu1 %v1540_v0 }
  0x19   :  { %1319 = vmatprep.subr.mxu1 %v1540_v0  ;;  %1327 = vmatprep.mubr.msk.f32.mxu1 %vm1541_vm0, %v1540_v0  ;;  %p1521_p9 = pnand %p1520_p8, %p1514_p5 }
  0x1a   :  { %1320 = vmatpush3.msra.mxu1 %v1611_v3  ;;  %1330 = vmatprep.subr.mxu0 %v1540_v0 }
  0x1b   :  { %1321 = vmatprep.subr.mxu1 %v1540_v0  ;;  %1331 = vmatpush3.msra.mxu0 %v1611_v3 }
  0x1c   :  { %1322 = vmatpush3.msra.mxu1 %v1617_v4  ;;  %1332 = vmatprep.subr.mxu0 %v1540_v0 }
  0x1d   :  { %1323 = vmatprep.subr.mxu1 %v1540_v0  ;;  %1333 = vmatpush3.msra.mxu0 %v1617_v4 }
  0x1e   :  { %1324 = vmatpush3.msra.mxu1 %v1630_v7  ;;  %1334 = vmatprep.subr.mxu0 %v1540_v0 }
  0x1f   :  { %1325 = vmatprep.subr.mxu1 %v1540_v0  ;;  %1335 = vmatpush3.msra.mxu0 %v1630_v7 }
  0x20   :  { %1326 = vmatpush3.msra.mxu1 %v1640_v9  ;;  %1336 = vmatprep.subr.mxu0 %v1540_v0 }
  0x21   :  { %1337 = vmatpush3.msra.mxu0 %v1640_v9  ;;  %1341 = vmatprep.subr.mxu1 %v1540_v0 }
  0x22   :  { %1352 = vmatprep.subr.mxu0 %v1540_v0  ;;  %1427 = vset.pattern.permute.xlu1 %v1542_v12 }
  0x23   :  { %1428 = vset.pattern.permute.xlu0 %v1542_v12  ;;  %202 = vperm.xlu1 %1427, %v200_v11  }
  0x24   :  { %1299 = vmatprep.mubr.msk.f32.mxu0 %vm70_vm1, %v53_v51 }
  0x25   :  { %1300 = vmatmul.mubr.msk.f32.gmra.mxu0 %vm70_vm1, %v54_v52 }
  0x26   :  { %1302 = vmatprep.mubr.msk.f32.mxu0 %vm70_vm1, %v55_v53 }
  0x29   :  { %1303 = vmatmul.mubr.msk.f32.gmra.mxu0 %vm70_vm1, %v56_v54 }
  0x2a   :  { %1305 = vmatprep.mubr.msk.f32.mxu0 %vm70_vm1, %v57_v55 }
  0x2d   :  { %1306 = vmatmul.mubr.msk.f32.gmra.mxu0 %vm70_vm1, %v58_v56 }
  0x2e   :  { %1338 = vmatprep.mubr.msk.f32.mxu0 %vm1541_vm0, %v1540_v0 }
  0x9e   :  { %v1682_v31 = vpop.permute.xlu1 %202 }
  0x9f   :  { %vm204_vm2 = vcmp.gt.s32.totalorder %v1682_v31, 0  ;;  %vm205_vm3 = vcmp.gt.s32.totalorder %v1682_v31, 1  ;;  %vm206_vm4 = vcmp.gt.s32.totalorder %v1682_v31, 2  ;;  %vm207_vm5 = vcmp.gt.s32.totalorder %v1682_v31, 3 }
  0xa0   :  { %vm208_vm6 = vcmp.gt.s32.totalorder %v1682_v31, 4  ;;  %vm209_vm7 = vcmp.gt.s32.totalorder %v1682_v31, 5  ;;  %vm210_vm8 = vcmp.gt.s32.totalorder %v1682_v31, 6  ;;  %vm211_vm9 = vcmp.gt.s32.totalorder %v1682_v31, 7 }
  0xd8   :  { %v1298_v13 = vpop.f32.mrf.mxu0  ;;  %v281_v14 = vpop.f32.mrf.mxu1 }
  0xd9   :  { %v167_v36 = vadd.f32 %v1298_v13, %v1676_v15 }
  0xda   :  { %v161_v16 = vpop.f32.mrf.mxu0  ;;  %v1318_v17 = vpop.f32.mrf.mxu1 }
  0xdb   :  { %v162_v18 = vadd.f32 %v1676_v15, %v161_v16 }
  0xdd   :  { %v282_v19 = vadd.f32 %v281_v14, %v162_v18 }
  0xdf   :  { %1429 = vtanh.f32 %v282_v19  ;;  %v1208_v21 = vmul.f32 -1.442695, %v282_v19 }
  0xe1   :  { %1431 = vpow2.f32 %v1208_v21 }
  0xe5   :  { %v1301_v62 = vpop.f32.mrf.mxu0 }
  0xe7   :  { %v171_v63 = vpop.f32.mrf.mxu0 }
  0xe8   :  { %v172_v8 = vadd.f32 %v1676_v15, %v171_v63 }
  0xe9   :  { %v1746_v1 = vpop.f32.mrf.mxu0 }
  0xeb   :  { %v1748_v2 = vpop.f32.mrf.mxu0 }
  0xec   :  { %v1430_v20 = vpop.eup %1429  ;;  %v182_v51 = vadd.f32 %v1676_v15, %v1748_v2 }
  0xed   :  { %294 = vrot.lane.b32.xlu0 %v1430_v20, %s1543_s16  ;;  %v1750_v5 = vpop.f32.mrf.mxu0 }
  0xee   :  { %v1432_v22 = vpop.eup %1431 }
  0xef   :  { %v288_v23 = vadd.f32 1.0, %v1432_v22  ;;  %v1752_v6 = vpop.f32.mrf.mxu0 }
  0xf1   :  { %1433 = vrcp.f32 %v288_v23 }
  0xfe   :  { %v1434_v24 = vpop.eup %1433 }
  0xff   :  { %v292_v27 = vmul.f32 0.0, %v1434_v24 }
 0x15f   :  { %v295_v25 = vpop.permute.xlu0 %294 }
 0x160   :  { %v297_v26 = vmul.f32 %v1434_v24, %v295_v25 }
 0x162   :  { %299 = vrot.lane.b32.xlu0 %v297_v26, %s1544_s2 }
 0x1d4   :  { %v300_v28 = vpop.permute.xlu0 %299 }
 0x1d5   :  { %v302_v29 = vadd.f32 %v300_v28, %v292_v27 }
 0x1d7   :  { %1435 = vtanh.f32 %v302_v29  ;;  %v310_v47 = vsel %vm204_vm2, %v302_v29, 0.0 }
 0x1e4   :  { %v1436_v30 = vpop.eup %1435 }
 0x1e5   :  { %305 = vrot.lane.b32.xlu1 %v1436_v30, %s1543_s16  ;;  %v177_v30 = vadd.f32 %v1301_v62, %v1676_v15 }
 0x257   :  { %v306_v32 = vpop.permute.xlu1 %305 }
 0x258   :  { %v308_v33 = vmul.f32 %v1434_v24, %v306_v32 }
 0x25a   :  { %v309_v34 = vsel %vm204_vm2, %v308_v33, 0.0 }
 0x25b   :  { %312 = vrot.lane.b32.xlu0 %v309_v34, %s1544_s2 }
 0x2cd   :  { %v313_v35 = vpop.permute.xlu0 %312 }
 0x2ce   :  { %1328 = vmatmul.mubr.msk.f32.vlgmr.msra.gmra.mxu1 %vm70_vm1, %v313_v35 }
 0x2cf   :  { %1342 = vmatpush3.msra.mxu1 %v1611_v3  ;;  %1349 = vmatprep.mubr.msk.f32.mxu1 %vm1541_vm0, %v1540_v0 }
 0x2d0   :  { %1343 = vmatprep.subr.mxu1 %v1540_v0 }
 0x2d1   :  { %1344 = vmatpush3.msra.mxu1 %v1617_v4 }
 0x2d2   :  { %1345 = vmatprep.subr.mxu1 %v1540_v0 }
 0x2d3   :  { %1346 = vmatpush3.msra.mxu1 %v1630_v7 }
 0x2d4   :  { %1347 = vmatprep.subr.mxu1 %v1540_v0 }
 0x2d5   :  { %1348 = vmatpush3.msra.mxu1 %v1640_v9 }
 0x2d6   :  { %1363 = vmatprep.subr.mxu1 %v1540_v0 }
 0x38e   :  { %v382_v37 = vpop.f32.mrf.mxu1 }
 0x38f   :  { %v383_v38 = vadd.f32 %v382_v37, %v167_v36 }
 0x390   :  { %v1329_v39 = vpop.f32.mrf.mxu1 }
 0x391   :  { %1437 = vtanh.f32 %v383_v38  ;;  %v1210_v41 = vmul.f32 -1.442695, %v383_v38 }
 0x393   :  { %1439 = vpow2.f32 %v1210_v41 }
 0x39e   :  { %v1438_v40 = vpop.eup %1437 }
 0x39f   :  { %395 = vrot.lane.b32.xlu1 %v1438_v40, %s1543_s16 }
 0x3a0   :  { %v1440_v42 = vpop.eup %1439 }
 0x3a1   :  { %v389_v43 = vadd.f32 1.0, %v1440_v42 }
 0x3a3   :  { %1441 = vrcp.f32 %v389_v43 }
 0x3b0   :  { %v1442_v44 = vpop.eup %1441 }
 0x3b1   :  { %v393_v48 = vmul.f32 %v1442_v44, %v310_v47 }
 0x411   :  { %v396_v45 = vpop.permute.xlu1 %395 }
 0x412   :  { %v398_v46 = vmul.f32 %v1442_v44, %v396_v45 }
 0x414   :  { %400 = vrot.lane.b32.xlu0 %v398_v46, %s1544_s2 }
 0x486   :  { %v401_v49 = vpop.permute.xlu0 %400 }
 0x487   :  { %v403_v50 = vadd.f32 %v401_v49, %v393_v48 }
 0x489   :  { %1443 = vtanh.f32 %v403_v50  ;;  %v411_v21 = vsel %vm205_vm3, %v403_v50, %v310_v47 }
 0x496   :  { %v1444_v57 = vpop.eup %1443 }
 0x497   :  { %406 = vrot.lane.b32.xlu1 %v1444_v57, %s1543_s16 }
 0x509   :  { %v407_v58 = vpop.permute.xlu1 %406 }
 0x50a   :  { %v409_v59 = vmul.f32 %v1442_v44, %v407_v58 }
 0x50c   :  { %v410_v60 = vsel %vm205_vm3, %v409_v59, %v309_v34 }
 0x50d   :  { %413 = vrot.lane.b32.xlu0 %v410_v60, %s1544_s2 }
 0x57f   :  { %v414_v61 = vpop.permute.xlu0 %413 }
 0x580   :  { %1339 = vmatmul.mubr.msk.f32.vlgmr.msra.gmra.mxu0 %vm70_vm1, %v414_v61 }
 0x581   :  { %1353 = vmatpush3.msra.mxu0 %v1611_v3  ;;  %1360 = vmatprep.mubr.msk.f32.mxu0 %vm1541_vm0, %v1540_v0 }
 0x582   :  { %1354 = vmatprep.subr.mxu0 %v1540_v0 }
 0x583   :  { %1355 = vmatpush3.msra.mxu0 %v1617_v4 }
 0x584   :  { %1356 = vmatprep.subr.mxu0 %v1540_v0 }
 0x585   :  { %1357 = vmatpush3.msra.mxu0 %v1630_v7 }
 0x586   :  { %1358 = vmatprep.subr.mxu0 %v1540_v0 }
 0x587   :  { %1359 = vmatpush3.msra.mxu0 %v1640_v9 }
 0x588   :  { %1374 = vmatprep.subr.mxu0 %v1540_v0 }
 0x640   :  { %v483_v10 = vpop.f32.mrf.mxu0 }
 0x641   :  { %v484_v11 = vadd.f32 %v483_v10, %v172_v8 }
 0x642   :  { %v1340_v12 = vpop.f32.mrf.mxu0 }
 0x643   :  { %1445 = vtanh.f32 %v484_v11  ;;  %v1212_v14 = vmul.f32 -1.442695, %v484_v11 }
 0x645   :  { %1447 = vpow2.f32 %v1212_v14 }
 0x650   :  { %v1446_v13 = vpop.eup %1445 }
 0x651   :  { %496 = vrot.lane.b32.xlu1 %v1446_v13, %s1543_s16 }
 0x652   :  { %v1448_v16 = vpop.eup %1447 }
 0x653   :  { %v490_v17 = vadd.f32 1.0, %v1448_v16 }
 0x655   :  { %1449 = vrcp.f32 %v490_v17 }
 0x662   :  { %v1450_v18 = vpop.eup %1449 }
 0x663   :  { %v494_v22 = vmul.f32 %v1450_v18, %v411_v21 }
 0x6c3   :  { %v497_v19 = vpop.permute.xlu1 %496 }
 0x6c4   :  { %v499_v20 = vmul.f32 %v1450_v18, %v497_v19 }
 0x6c6   :  { %501 = vrot.lane.b32.xlu0 %v499_v20, %s1544_s2 }
 0x738   :  { %v502_v23 = vpop.permute.xlu0 %501 }
 0x739   :  { %v504_v24 = vadd.f32 %v502_v23, %v494_v22 }
 0x73b   :  { %1451 = vtanh.f32 %v504_v24  ;;  %v512_v42 = vsel %vm206_vm4, %v504_v24, %v411_v21 }
 0x748   :  { %v1452_v25 = vpop.eup %1451 }
 0x749   :  { %507 = vrot.lane.b32.xlu1 %v1452_v25, %s1543_s16 }
 0x7bb   :  { %v508_v26 = vpop.permute.xlu1 %507 }
 0x7bc   :  { %v510_v27 = vmul.f32 %v1450_v18, %v508_v26 }
 0x7be   :  { %v511_v28 = vsel %vm206_vm4, %v510_v27, %v410_v60 }
 0x7bf   :  { %514 = vrot.lane.b32.xlu0 %v511_v28, %s1544_s2 }
 0x831   :  { %v515_v29 = vpop.permute.xlu0 %514 }
 0x832   :  { %1350 = vmatmul.mubr.msk.f32.vlgmr.msra.gmra.mxu1 %vm70_vm1, %v515_v29 }
 0x833   :  { %1364 = vmatpush3.msra.mxu1 %v1611_v3  ;;  %1371 = vmatprep.mubr.msk.f32.mxu1 %vm1541_vm0, %v1540_v0 }
 0x834   :  { %1365 = vmatprep.subr.mxu1 %v1540_v0 }
 0x835   :  { %1366 = vmatpush3.msra.mxu1 %v1617_v4 }
 0x836   :  { %1367 = vmatprep.subr.mxu1 %v1540_v0 }
 0x837   :  { %1368 = vmatpush3.msra.mxu1 %v1630_v7 }
 0x838   :  { %1369 = vmatprep.subr.mxu1 %v1540_v0 }
 0x839   :  { %1370 = vmatpush3.msra.mxu1 %v1640_v9 }
 0x83a   :  { %1385 = vmatprep.subr.mxu1 %v1540_v0 }
 0x8f2   :  { %v584_v32 = vpop.f32.mrf.mxu1 }
 0x8f3   :  { %v585_v33 = vadd.f32 %v584_v32, %v177_v30  ;;  %v192_v32 = vadd.f32 %v1676_v15, %v1752_v6 }
 0x8f4   :  { %v1351_v34 = vpop.f32.mrf.mxu1 }
 0x8f5   :  { %1453 = vtanh.f32 %v585_v33  ;;  %v1214_v36 = vmul.f32 -1.442695, %v585_v33 }
 0x8f7   :  { %1455 = vpow2.f32 %v1214_v36 }
 0x902   :  { %v1454_v35 = vpop.eup %1453 }
 0x903   :  { %597 = vrot.lane.b32.xlu1 %v1454_v35, %s1543_s16 }
 0x904   :  { %v1456_v37 = vpop.eup %1455 }
 0x905   :  { %v591_v38 = vadd.f32 1.0, %v1456_v37 }
 0x907   :  { %1457 = vrcp.f32 %v591_v38 }
 0x914   :  { %v1458_v39 = vpop.eup %1457 }
 0x915   :  { %v595_v43 = vmul.f32 %v1458_v39, %v512_v42 }
 0x975   :  { %v598_v40 = vpop.permute.xlu1 %597 }
 0x976   :  { %v600_v41 = vmul.f32 %v1458_v39, %v598_v40 }
 0x978   :  { %602 = vrot.lane.b32.xlu0 %v600_v41, %s1544_s2 }
 0x9ea   :  { %v603_v44 = vpop.permute.xlu0 %602 }
 0x9eb   :  { %v605_v45 = vadd.f32 %v603_v44, %v595_v43 }
 0x9ed   :  { %1459 = vtanh.f32 %v605_v45  ;;  %v613_v62 = vsel %vm207_vm5, %v605_v45, %v512_v42 }
 0x9fa   :  { %v1460_v46 = vpop.eup %1459 }
 0x9fb   :  { %608 = vrot.lane.b32.xlu1 %v1460_v46, %s1543_s16 }
 0xa6d   :  { %v609_v47 = vpop.permute.xlu1 %608 }
 0xa6e   :  { %v611_v48 = vmul.f32 %v1458_v39, %v609_v47 }
 0xa70   :  { %v612_v49 = vsel %vm207_vm5, %v611_v48, %v511_v28 }
 0xa71   :  { %615 = vrot.lane.b32.xlu0 %v612_v49, %s1544_s2 }
 0xae3   :  { %v616_v50 = vpop.permute.xlu0 %615 }
 0xae4   :  { %1361 = vmatmul.mubr.msk.f32.vlgmr.msra.gmra.mxu0 %vm70_vm1, %v616_v50 }
 0xae5   :  { %1375 = vmatpush3.msra.mxu0 %v1611_v3  ;;  %1382 = vmatprep.mubr.msk.f32.mxu0 %vm1541_vm0, %v1540_v0 }
 0xae6   :  { %1376 = vmatprep.subr.mxu0 %v1540_v0 }
 0xae7   :  { %1377 = vmatpush3.msra.mxu0 %v1617_v4 }
 0xae8   :  { %1378 = vmatprep.subr.mxu0 %v1540_v0 }
 0xae9   :  { %1379 = vmatpush3.msra.mxu0 %v1630_v7 }
 0xaea   :  { %1380 = vmatprep.subr.mxu0 %v1540_v0 }
 0xaeb   :  { %1381 = vmatpush3.msra.mxu0 %v1640_v9 }
 0xaec   :  { %1396 = vmatprep.subr.mxu0 %v1540_v0 }
 0xba4   :  { %v685_v52 = vpop.f32.mrf.mxu0 }
 0xba5   :  { %v686_v53 = vadd.f32 %v685_v52, %v182_v51  ;;  %v197_v51 = vadd.f32 %v1750_v5, %v1676_v15 }
 0xba6   :  { %v1362_v54 = vpop.f32.mrf.mxu0 }
 0xba7   :  { %1461 = vtanh.f32 %v686_v53  ;;  %v1216_v56 = vmul.f32 -1.442695, %v686_v53 }
 0xba9   :  { %1463 = vpow2.f32 %v1216_v56 }
 0xbb4   :  { %v1462_v55 = vpop.eup %1461 }
 0xbb5   :  { %698 = vrot.lane.b32.xlu1 %v1462_v55, %s1543_s16 }
 0xbb6   :  { %v1464_v57 = vpop.eup %1463 }
 0xbb7   :  { %v692_v58 = vadd.f32 1.0, %v1464_v57 }
 0xbb9   :  { %1465 = vrcp.f32 %v692_v58 }
 0xbc6   :  { %v1466_v59 = vpop.eup %1465 }
 0xbc7   :  { %v696_v63 = vmul.f32 %v1466_v59, %v613_v62 }
 0xc27   :  { %v699_v60 = vpop.permute.xlu1 %698 }
 0xc28   :  { %v701_v61 = vmul.f32 %v1466_v59, %v699_v60 }
 0xc2a   :  { %703 = vrot.lane.b32.xlu0 %v701_v61, %s1544_s2 }
 0xc9c   :  { %v704_v2 = vpop.permute.xlu0 %703 }
 0xc9d   :  { %v706_v8 = vadd.f32 %v704_v2, %v696_v63  ;;  %v1026_v2 = vld [vmem:[#allocation2 + $0x18] sm:$0xff] }
 0xc9f   :  { %1467 = vtanh.f32 %v706_v8 }
 0xcac   :  { %v1468_v10 = vpop.eup %1467 }
 0xcad   :  { %709 = vrot.lane.b32.xlu1 %v1468_v10, %s1543_s16  ;;  %v1021_v10 = vld [vmem:[%s1890_s6 + $0x18] sm:$0xff] }
 0xd1f   :  { %v710_v11 = vpop.permute.xlu1 %709 }
 0xd20   :  { %v712_v12 = vmul.f32 %v1466_v59, %v710_v11  ;;  %v1020_v11 = vld [vmem:[%s1890_s6 + $0x10] sm:$0xff] }
 0xd22   :  { %v713_v13 = vsel %vm208_vm6, %v712_v12, %v612_v49  ;;  %v1024_v12 = vld [vmem:[#allocation2 + $0x8] sm:$0xff] }
 0xd23   :  { %716 = vrot.lane.b32.xlu0 %v713_v13, %s1544_s2 }
 0xd95   :  { %v717_v14 = vpop.permute.xlu0 %716 }
 0xd96   :  { %1372 = vmatmul.mubr.msk.f32.vlgmr.msra.gmra.mxu1 %vm70_vm1, %v717_v14  ;;  %v1023_v14 = vld [vmem:[#allocation2] sm:$0xff] }
 0xd97   :  { %1386 = vmatpush3.msra.mxu1 %v1611_v3  ;;  %1393 = vmatprep.mubr.msk.f32.mxu1 %vm1541_vm0, %v1540_v0  ;;  %v187_v3 = vadd.f32 %v1746_v1, %v1676_v15  ;;  %v714_v1 = vsel %vm208_vm6, %v706_v8, %v613_v62  ;;  %v1025_v8 = vld [vmem:[#allocation2 + $0x10] sm:$0xff] }
 0xd98   :  { %1387 = vmatprep.subr.mxu1 %v1540_v0 }
 0xd99   :  { %1388 = vmatpush3.msra.mxu1 %v1617_v4 }
 0xd9a   :  { %1389 = vmatprep.subr.mxu1 %v1540_v0 }
 0xd9b   :  { %1390 = vmatpush3.msra.mxu1 %v1630_v7 }
 0xd9c   :  { %1391 = vmatprep.subr.mxu1 %v1540_v0 }
 0xd9d   :  { %1392 = vmatpush3.msra.mxu1 %v1640_v9 }
 0xd9e   :  { %1407 = vmatprep.subr.mxu1 %v1540_v0 }
 0xe56   :  { %v786_v16 = vpop.f32.mrf.mxu1 }
 0xe57   :  { %v787_v17 = vadd.f32 %v786_v16, %v187_v3  ;;  %v1018_v3 = vld [vmem:[%s1890_s6] sm:$0xff] }
 0xe58   :  { %v1373_v18 = vpop.f32.mrf.mxu1  ;;  %v1022_v16 = vld [vmem:[%s1885_s1] sm:$0xff] }
 0xe59   :  { %1469 = vtanh.f32 %v787_v17  ;;  %v1218_v4 = vmul.f32 -1.442695, %v787_v17 }
 0xe5b   :  { %1471 = vpow2.f32 %v1218_v4 }
 0xe66   :  { %v1470_v19 = vpop.eup %1469 }
 0xe67   :  { %799 = vrot.lane.b32.xlu1 %v1470_v19, %s1543_s16 }
 0xe68   :  { %v1472_v20 = vpop.eup %1471 }
 0xe69   :  { %v793_v7 = vadd.f32 1.0, %v1472_v20 }
 0xe6b   :  { %1473 = vrcp.f32 %v793_v7 }
 0xe78   :  { %v1474_v21 = vpop.eup %1473 }
 0xe79   :  { %v797_v23 = vmul.f32 %v1474_v21, %v714_v1 }
 0xed9   :  { %v800_v22 = vpop.permute.xlu1 %799 }
 0xeda   :  { %v802_v9 = vmul.f32 %v1474_v21, %v800_v22 }
 0xedc   :  { %804 = vrot.lane.b32.xlu0 %v802_v9, %s1544_s2  ;;  %v1225_v9 = vld [vmem:[%s1892_s8] ss:$0 sm:$0xff] }
 0xf4e   :  { %v805_v24 = vpop.permute.xlu0 %804 }
 0xf4f   :  { %v807_v25 = vadd.f32 %v805_v24, %v797_v23 }
 0xf51   :  { %1475 = vtanh.f32 %v807_v25  ;;  %v815_v6 = vsel %vm209_vm7, %v807_v25, %v714_v1 }
 0xf5e   :  { %v1476_v26 = vpop.eup %1475 }
 0xf5f   :  { %810 = vrot.lane.b32.xlu1 %v1476_v26, %s1543_s16 }
 0xfd1   :  { %v811_v27 = vpop.permute.xlu1 %810 }
 0xfd2   :  { %v813_v28 = vmul.f32 %v1474_v21, %v811_v27 }
 0xfd4   :  { %v814_v29 = vsel %vm209_vm7, %v813_v28, %v713_v13  ;;  %v1019_v13 = vld [vmem:[%s1890_s6 + $0x8] sm:$0xff] }
 0xfd5   :  { %817 = vrot.lane.b32.xlu0 %v814_v29, %s1544_s2 }
0x1047   :  { %v818_v30 = vpop.permute.xlu0 %817 }
0x1048   :  { %1383 = vmatmul.mubr.msk.f32.vlgmr.msra.gmra.mxu0 %vm70_vm1, %v818_v30 }
0x1049   :  { %1404 = vmatprep.mubr.msk.f32.mxu0 %vm1541_vm0, %v1540_v0  ;;  %1397 = vmatpush3.msra.mxu0 %v1026_v2 }
0x104a   :  { %1398 = vmatprep.subr.mxu0 %v1540_v0 }
0x104b   :  { %1399 = vmatpush3.msra.mxu0 %v1025_v8 }
0x104c   :  { %1400 = vmatprep.subr.mxu0 %v1540_v0 }
0x104d   :  { %1401 = vmatpush3.msra.mxu0 %v1024_v12 }
0x104e   :  { %1402 = vmatprep.subr.mxu0 %v1540_v0 }
0x104f   :  { %1403 = vmatpush3.msra.mxu0 %v1023_v14 }
0x1050   :  { %1405 = vmatmul.mubr.msk.f32.vlgmr.msra.gmra.mxu0 %vm70_vm1, %v1022_v16 }
0x1108   :  { %v887_v33 = vpop.f32.mrf.mxu0 }
0x1109   :  { %v888_v34 = vadd.f32 %v887_v33, %v192_v32 }
0x110a   :  { %v1384_v35 = vpop.f32.mrf.mxu0 }
0x110b   :  { %1477 = vtanh.f32 %v888_v34  ;;  %v1220_v37 = vmul.f32 -1.442695, %v888_v34 }
0x110d   :  { %1479 = vpow2.f32 %v1220_v37 }
0x1110   :  { %v1096_v7 = vpop.f32.mrf.mxu0 }
0x1112   :  { %v1406_v21 = vpop.f32.mrf.mxu0 }
0x1118   :  { %v1478_v36 = vpop.eup %1477 }
0x1119   :  { %900 = vrot.lane.b32.xlu1 %v1478_v36, %s1543_s16 }
0x111a   :  { %v1480_v38 = vpop.eup %1479 }
0x111b   :  { %v894_v39 = vadd.f32 1.0, %v1480_v38 }
0x111d   :  { %1481 = vrcp.f32 %v894_v39 }
0x112a   :  { %v1482_v40 = vpop.eup %1481 }
0x112b   :  { %v898_v43 = vmul.f32 %v1482_v40, %v815_v6 }
0x118b   :  { %v901_v41 = vpop.permute.xlu1 %900 }
0x118c   :  { %v903_v42 = vmul.f32 %v1482_v40, %v901_v41 }
0x118e   :  { %905 = vrot.lane.b32.xlu0 %v903_v42, %s1544_s2 }
0x1200   :  { %v906_v44 = vpop.permute.xlu0 %905 }
0x1201   :  { %v908_v45 = vadd.f32 %v906_v44, %v898_v43 }
0x1203   :  { %1483 = vtanh.f32 %v908_v45  ;;  %v916_v15 = vsel %vm210_vm8, %v908_v45, %v815_v6 }
0x1210   :  { %v1484_v46 = vpop.eup %1483 }
0x1211   :  { %911 = vrot.lane.b32.xlu1 %v1484_v46, %s1543_s16 }
0x1283   :  { %v912_v47 = vpop.permute.xlu1 %911 }
0x1284   :  { %v914_v48 = vmul.f32 %v1482_v40, %v912_v47 }
0x1286   :  { %v915_v49 = vsel %vm210_vm8, %v914_v48, %v814_v29 }
0x1287   :  { %918 = vrot.lane.b32.xlu0 %v915_v49, %s1544_s2 }
0x12f9   :  { %v919_v50 = vpop.permute.xlu0 %918 }
0x12fa   :  { %1394 = vmatmul.mubr.msk.f32.vlgmr.msra.gmra.mxu1 %vm70_vm1, %v919_v50 }
0x12fb   :  { %1415 = vmatprep.mubr.msk.f32.mxu1 %vm1541_vm0, %v1540_v0  ;;  %1408 = vmatpush3.msra.mxu1 %v1021_v10 }
0x12fc   :  { %1409 = vmatprep.subr.mxu1 %v1540_v0 }
0x12fd   :  { %1410 = vmatpush3.msra.mxu1 %v1020_v11 }
0x12fe   :  { %1411 = vmatprep.subr.mxu1 %v1540_v0 }
0x12ff   :  { %1412 = vmatpush3.msra.mxu1 %v1019_v13 }
0x1300   :  { %1413 = vmatprep.subr.mxu1 %v1540_v0 }
0x1301   :  { %1414 = vmatpush3.msra.mxu1 %v1018_v3 }
0x13ba   :  { %v988_v52 = vpop.f32.mrf.mxu1 }
0x13bb   :  { %v989_v53 = vadd.f32 %v988_v52, %v197_v51 }
0x13bc   :  { %v1395_v54 = vpop.f32.mrf.mxu1 }
0x13bd   :  { %1485 = vtanh.f32 %v989_v53  ;;  %v1222_v56 = vmul.f32 -1.442695, %v989_v53 }
0x13bf   :  { %1487 = vpow2.f32 %v1222_v56 }
0x13ca   :  { %v1486_v55 = vpop.eup %1485 }
0x13cb   :  { %1001 = vrot.lane.b32.xlu1 %v1486_v55, %s1543_s16 }
0x13cc   :  { %v1488_v57 = vpop.eup %1487 }
0x13cd   :  { %v995_v58 = vadd.f32 1.0, %v1488_v57 }
0x13cf   :  { %1489 = vrcp.f32 %v995_v58 }
0x13dc   :  { %v1490_v59 = vpop.eup %1489 }
0x13dd   :  { %v999_v5 = vmul.f32 %v1490_v59, %v916_v15 }
0x143d   :  { %v1002_v60 = vpop.permute.xlu1 %1001 }
0x143e   :  { %v1004_v61 = vmul.f32 %v1490_v59, %v1002_v60 }
0x1440   :  { %1006 = vrot.lane.b32.xlu0 %v1004_v61, %s1544_s2 }
0x14b2   :  { %v1007_v62 = vpop.permute.xlu0 %1006 }
0x14b3   :  { %v1009_v63 = vadd.f32 %v1007_v62, %v999_v5 }
0x14b5   :  { %1491 = vtanh.f32 %v1009_v63 }
0x14c2   :  { %v1492_v17 = vpop.eup %1491 }
0x14c3   :  { %1012 = vrot.lane.b32.xlu1 %v1492_v17, %s1543_s16 }
0x1535   :  { %v1013_v18 = vpop.permute.xlu1 %1012 }
0x1536   :  { %v1015_v19 = vmul.f32 %v1490_v59, %v1013_v18 }
0x1538   :  { %v1016_v4 = vsel %vm211_vm9, %v1015_v19, %v915_v49 }
0x1539   :  { %v1017_v20 = vmax.f32 %v1016_v4, 0.0 }
0x153b   :  { %1101 = vrot.lane.b32.xlu0 %v1017_v20, %s1544_s2 }
0x15ad   :  { %v1102_v22 = vpop.permute.xlu0 %1101 }
0x15ae   :  { %1416 = vmatmul.mubr.msk.f32.vlgmr.msra.gmra.mxu1 %vm70_vm1, %v1102_v22 }
0x166e   :  { %v1171_v0 = vpop.f32.mrf.mxu1 }
0x166f   :  { %v1172_v1 = vadd.f32 %v1171_v0, %v1096_v7 }
0x1670   :  { %v1417_v23 = vpop.f32.mrf.mxu1 }
0x1671   :  { %v1182_v24 = vadd.f32 %v1225_v9, %v1172_v1 }
0x1673   :  { %1183 = vst [vmem:[#allocation5] sm:$0xff] %v1182_v24 }
0x1674   :  { %1524 = shalt.err (!%p1521_p9)
}
0x1675   :  { %1193 = dma.vmem_to_hbm [thread:$0]  %s1191_s14, 128, %s1893_s9, [#allocation4]  }
0x1676   :  { %1535 = dma.done.wait [#allocation4], 128  }
0x1677   :  { %1536 = vsyncadd [#allocation4], 4294967168 }
0x1678   :  { %1197 = vsyncpa [#allocation3], 1 }
0x1679   :  { %1198 = vsyncpa [#allocation4], 1 }

</bundles_post_ra>
